<compile_context>
chip_gen: v7x
topology: tpu7x:2x2x1
jax: 0.10.0
libtpu: 0.0.40
codegen_flags: <defaults>
</compile_context>

<pallas_src>
import functools

import numpy as np
import jax
import jax.numpy as jnp
from jax import lax
from jax.experimental import pallas as pl
from jax.experimental.pallas import tpu as pltpu

_LANES = 128
_SUBLANES = 8


def _round_up(v, m):
    return ((v + m - 1) // m) * m


def _pad_last(a, target):
    if a.shape[-1] == target:
        return a
    pad = [(0, 0)] * (a.ndim - 1) + [(0, target - a.shape[-1])]
    return jnp.pad(a, pad)


def _vmem_budgets():
    """Generation-aware (v5e/v6e: 128 MiB physical, v7x: 64 MiB) VMEM budgets."""
    phys = 64 << 20
    try:
        info = pltpu.get_tpu_info()
        phys = int(getattr(info, "vmem_capacity_bytes", phys)) or phys
    except Exception:
        pass
    vmem_limit = int(min(phys - (8 << 20), 100 << 20))   # scoped limit for Mosaic
    act_budget = int(min(phys * 3 // 8, 48 << 20))       # activation tiles budget
    return vmem_limit, act_budget


def _pick_row_tile(n_rows, per_row_bytes, fixed_bytes, budget, max_tile):
    """Largest row tile (multiple of 8) s.t. fixed + per_row*tile <= budget."""
    avail = max(budget - fixed_bytes, _SUBLANES * per_row_bytes)
    tile = (avail // max(per_row_bytes, 1)) // _SUBLANES * _SUBLANES
    tile = max(_SUBLANES, min(int(tile),
                              _round_up(max_tile, _SUBLANES),
                              _round_up(max(n_rows, 1), _SUBLANES)))
    return int(tile)


# ----------------------------- LayerNorm helpers -----------------------------

def _layernorm_block(v, g, b, eps, valid_dim=None):
    """Two-pass (centered) LayerNorm of a (rows, D) tile in f32.

    If the lane axis is zero-padded, `valid_dim` is the true feature count:
    padded lanes are masked out of the variance and (because gamma/beta padding
    is zero) the padded output lanes are exactly 0.
    """
    v = v.astype(jnp.float32)
    d_pad = v.shape[-1]
    d = d_pad if valid_dim is None else valid_dim
    mean = jnp.sum(v, axis=-1, keepdims=True) * (1.0 / d)
    centered = v - mean
    if valid_dim is not None and valid_dim != d_pad:
        mask = lax.broadcasted_iota(jnp.int32, v.shape, v.ndim - 1) < valid_dim
        centered = jnp.where(mask, centered, 0.0)
    var = jnp.sum(centered * centered, axis=-1, keepdims=True) * (1.0 / d)
    inv = lax.rsqrt(var + eps)                       # EUP
    return centered * inv * g.astype(jnp.float32) + b.astype(jnp.float32)


# --------------------------- standalone LayerNorm ----------------------------

def _layernorm_kernel(x_ref, g_ref, b_ref, o_ref, *, eps):
    o_ref[...] = _layernorm_block(x_ref[...], g_ref[...], b_ref[...],
                                  eps).astype(o_ref.dtype)


def layernorm_pallas(x, gamma, beta, *, eps=1e-5, max_row_tile=1024):
    """LayerNorm over the last axis of x (any leading shape)."""
    orig_shape = x.shape
    d = orig_shape[-1]
    x2d = x.reshape(-1, d)
    n = x2d.shape[0]
    itemsize = x2d.dtype.itemsize
    vmem_limit, act_budget = _vmem_budgets()

    per_row = itemsize * 2 * 2 * d                     # in + out, double-buffered
    fixed = 2 * 2 * 4 * d                              # gamma/beta
    tile = _pick_row_tile(n, per_row, fixed, act_budget, max_row_tile)

    out = pl.pallas_call(
        functools.partial(_layernorm_kernel, eps=eps),
        out_shape=jax.ShapeDtypeStruct((n, d), x.dtype),
        grid_spec=pltpu.PrefetchScalarGridSpec(
            num_scalar_prefetch=0,
            grid=(pl.cdiv(n, tile),),
            in_specs=[
                pl.BlockSpec((tile, d), lambda i: (i, 0)),
                pl.BlockSpec((1, d), lambda i: (0, 0)),
                pl.BlockSpec((1, d), lambda i: (0, 0)),
            ],
            out_specs=pl.BlockSpec((tile, d), lambda i: (i, 0)),
        ),
        compiler_params=pltpu.CompilerParams(
            dimension_semantics=("parallel",),
            vmem_limit_bytes=vmem_limit),
        cost_estimate=pl.CostEstimate(
            flops=10 * n * d,
            transcendentals=n,
            bytes_accessed=2 * n * d * itemsize + 2 * d * 4),
    )(x2d, gamma.reshape(1, d), beta.reshape(1, d))
    return out.reshape(orig_shape)


# ------------------ fused dual LayerNorm (generic PreNorm path) --------------

def _dual_layernorm_kernel(x_ref, c_ref, gx_ref, bx_ref, gc_ref, bc_ref,
                           ox_ref, oc_ref, *, eps):
    ox_ref[...] = _layernorm_block(x_ref[...], gx_ref[...], bx_ref[...],
                                   eps).astype(ox_ref.dtype)
    oc_ref[...] = _layernorm_block(c_ref[...], gc_ref[...], bc_ref[...],
                                   eps).astype(oc_ref.dtype)


def dual_layernorm_pallas(x, gx, bx, c, gc, bc, *, eps=1e-5, max_row_tile=1024):
    """LayerNorm(x) and LayerNorm(context) in one pallas_call (two outputs)."""
    dx, dc = x.shape[-1], c.shape[-1]
    x2d = x.reshape(-1, dx)
    c2d = c.reshape(-1, dc)
    n = x2d.shape[0]
    if c2d.shape[0] != n:
        # Different row counts -> cannot share a row grid; two separate calls.
        return (layernorm_pallas(x, gx, bx, eps=eps),
                layernorm_pallas(c, gc, bc, eps=eps))

    itemsize = max(x2d.dtype.itemsize, c2d.dtype.itemsize)
    vmem_limit, act_budget = _vmem_budgets()
    per_row = itemsize * 2 * 2 * (dx + dc)
    fixed = 2 * 2 * 4 * (dx + dc)
    tile = _pick_row_tile(n, per_row, fixed, act_budget, max_row_tile)

    ox, oc = pl.pallas_call(
        functools.partial(_dual_layernorm_kernel, eps=eps),
        out_shape=(jax.ShapeDtypeStruct((n, dx), x.dtype),
                   jax.ShapeDtypeStruct((n, dc), c.dtype)),
        grid_spec=pltpu.PrefetchScalarGridSpec(
            num_scalar_prefetch=0,
            grid=(pl.cdiv(n, tile),),
            in_specs=[
                pl.BlockSpec((tile, dx), lambda i: (i, 0)),
                pl.BlockSpec((tile, dc), lambda i: (i, 0)),
                pl.BlockSpec((1, dx), lambda i: (0, 0)),
                pl.BlockSpec((1, dx), lambda i: (0, 0)),
                pl.BlockSpec((1, dc), lambda i: (0, 0)),
                pl.BlockSpec((1, dc), lambda i: (0, 0)),
            ],
            out_specs=[pl.BlockSpec((tile, dx), lambda i: (i, 0)),
                       pl.BlockSpec((tile, dc), lambda i: (i, 0))],
        ),
        compiler_params=pltpu.CompilerParams(
            dimension_semantics=("parallel",),
            vmem_limit_bytes=vmem_limit),
        cost_estimate=pl.CostEstimate(
            flops=10 * n * (dx + dc),
            transcendentals=2 * n,
            bytes_accessed=2 * n * (dx + dc) * itemsize + 2 * (dx + dc) * 4),
    )(x2d, c2d, gx.reshape(1, dx), bx.reshape(1, dx),
      gc.reshape(1, dc), bc.reshape(1, dc))
    return ox.reshape(x.shape), oc.reshape(c.shape)


# ------------------- example `fn`: linear mix of x and context ---------------

def _linear_mix_kernel(x_ref, wx_ref, c_ref, wc_ref, o_ref):
    mxu_dtype = wx_ref.dtype
    acc = jnp.dot(x_ref[...].astype(mxu_dtype), wx_ref[...],
                  preferred_element_type=jnp.float32)
    acc = acc + jnp.dot(c_ref[...].astype(mxu_dtype), wc_ref[...],
                        preferred_element_type=jnp.float32)
    o_ref[...] = acc.astype(o_ref.dtype)


def linear_mix_pallas(x, wx, context, wc, *, max_row_tile=1024):
    b, s, d = x.shape
    dc = context.shape[-1]
    d_out = wx.shape[1]
    n = b * s
    x2d = x.reshape(n, d)
    c2d = context.reshape(n, dc)

    itemsize = x.dtype.itemsize
    w_itemsize = wx.dtype.itemsize
    vmem_limit, act_budget = _vmem_budgets()
    per_row = itemsize * 2 * (d + dc + d_out)          # double-buffered activations
    fixed = 2 * w_itemsize * (d + dc) * d_out          # resident weights (x2 buffers)
    tm = _pick_row_tile(n, per_row, fixed, act_budget, max_row_tile)

    out = pl.pallas_call(
        _linear_mix_kernel,
        out_shape=jax.ShapeDtypeStruct((n, d_out), x.dtype),
        grid_spec=pltpu.PrefetchScalarGridSpec(
            num_scalar_prefetch=0,
            grid=(pl.cdiv(n, tm),),
            in_specs=[
                pl.BlockSpec((tm, d), lambda i: (i, 0)),
                pl.BlockSpec((d, d_out), lambda i: (0, 0)),   # weights resident
                pl.BlockSpec((tm, dc), lambda i: (i, 0)),
                pl.BlockSpec((dc, d_out), lambda i: (0, 0)),
            ],
            out_specs=pl.BlockSpec((tm, d_out), lambda i: (i, 0)),
        ),
        compiler_params=pltpu.CompilerParams(
            dimension_semantics=("parallel",),
            vmem_limit_bytes=vmem_limit),
        cost_estimate=pl.CostEstimate(
            flops=2 * n * (d + dc) * d_out,
            transcendentals=0,
            bytes_accessed=itemsize * n * (d + dc + d_out)
                           + w_itemsize * (d + dc) * d_out),
    )(x2d, wx, c2d, wc)
    return out.reshape(b, s, d_out)


# ------------------ fused fast path: LN(x), LN(ctx), linear mix ---------------

def _prenorm_mix_kernel(x_ref, c_ref, gx_ref, bx_ref, gc_ref, bc_ref,
                        wx_ref, wc_ref, o_ref, *, d_x, d_c, eps):
    xn = _layernorm_block(x_ref[...], gx_ref[...], bx_ref[...], eps, valid_dim=d_x)
    cn = _layernorm_block(c_ref[...], gc_ref[...], bc_ref[...], eps, valid_dim=d_c)
    mxu_dtype = wx_ref.dtype
    # Two dots straight out of vregs (no VMEM concat scratch); same MXU K-pass
    # count as the stacked-weight formulation.
    acc = jnp.dot(xn.astype(mxu_dtype), wx_ref[...],
                  preferred_element_type=jnp.float32)
    acc = acc + jnp.dot(cn.astype(mxu_dtype), wc_ref[...],
                        preferred_element_type=jnp.float32)
    o_ref[...] = acc.astype(o_ref.dtype)


def prenorm_linear_mix_fused(x, context, wx, wc,
                             gamma_x, beta_x, gamma_c, beta_c,
                             *, eps=1e-5, max_row_tile=1024, mxu_dtype=None):
    """PreNorm(dim, fn=linear-mix, context_dim) fully fused in one pallas_call."""
    b, s, d = x.shape
    dc = context.shape[-1]
    d_out = wx.shape[1]
    n = b * s

    # MXU feed dtype follows the activation dtype (bf16 in -> bf16 MXU feeds
    # with f32 accumulation); f32 inputs keep f32 feeds for tight numerics.
    if mxu_dtype is None:
        mxu_dtype = jnp.bfloat16 if x.dtype == jnp.bfloat16 else jnp.float32

    # Lane-dense (multiple-of-128) feature axes; zero padding is exact because
    # gamma/beta/weight padding is zero and the stats use the true counts.
    d_p = _round_up(d, _LANES)
    dc_p = _round_up(dc, _LANES)
    do_p = _round_up(d_out, _LANES)

    x2d = _pad_last(x.reshape(n, d), d_p)
    c2d = _pad_last(context.reshape(n, dc), dc_p)
    gx = _pad_last(gamma_x.reshape(1, d).astype(jnp.float32), d_p)
    bx = _pad_last(beta_x.reshape(1, d).astype(jnp.float32), d_p)
    gc = _pad_last(gamma_c.reshape(1, dc).astype(jnp.float32), dc_p)
    bc = _pad_last(beta_c.reshape(1, dc).astype(jnp.float32), dc_p)
    wx_p = jnp.pad(wx, ((0, d_p - d), (0, do_p - d_out))).astype(mxu_dtype)
    wc_p = jnp.pad(wc, ((0, dc_p - dc), (0, do_p - d_out))).astype(mxu_dtype)

    itemsize = x.dtype.itemsize
    w_itemsize = np.dtype(mxu_dtype).itemsize
    vmem_limit, act_budget = _vmem_budgets()

    # Tile d_out if the (double-buffered) weight tiles would eat the budget;
    # keeps the kernel compiling/pipelined even on v7x's 64 MiB VMEM.
    weight_budget = act_budget // 3
    tn = do_p
    while tn > _LANES and 2 * w_itemsize * (d_p + dc_p) * tn > weight_budget:
        tn = _round_up(tn // 2, _LANES)

    per_row = itemsize * 2 * (d_p + dc_p + tn)
    fixed = 2 * w_itemsize * (d_p + dc_p) * tn + 2 * 2 * 4 * (d_p + dc_p)
    tm = _pick_row_tile(n, per_row, fixed, act_budget, max_row_tile)

    kernel = functools.partial(_prenorm_mix_kernel, d_x=d, d_c=dc, eps=eps)

    out = pl.pallas_call(
        kernel,
        out_shape=jax.ShapeDtypeStruct((n, do_p), x.dtype),
        grid_spec=pltpu.PrefetchScalarGridSpec(
            num_scalar_prefetch=0,
            grid=(pl.cdiv(n, tm), pl.cdiv(do_p, tn)),
            in_specs=[
                pl.BlockSpec((tm, d_p), lambda i, j: (i, 0)),
                pl.BlockSpec((tm, dc_p), lambda i, j: (i, 0)),
                pl.BlockSpec((1, d_p), lambda i, j: (0, 0)),
                pl.BlockSpec((1, d_p), lambda i, j: (0, 0)),
                pl.BlockSpec((1, dc_p), lambda i, j: (0, 0)),
                pl.BlockSpec((1, dc_p), lambda i, j: (0, 0)),
                pl.BlockSpec((d_p, tn), lambda i, j: (0, j)),
                pl.BlockSpec((dc_p, tn), lambda i, j: (0, j)),
            ],
            out_specs=pl.BlockSpec((tm, tn), lambda i, j: (i, j)),
        ),
        compiler_params=pltpu.CompilerParams(
            dimension_semantics=("parallel", "parallel"),  # rows shard across 2 TCs
            vmem_limit_bytes=vmem_limit),
        cost_estimate=pl.CostEstimate(
            flops=2 * n * (d_p + dc_p) * do_p + 10 * n * (d_p + dc_p),
            transcendentals=2 * n,
            bytes_accessed=itemsize * n * (d_p + dc_p + do_p)
                           + w_itemsize * (d_p + dc_p) * do_p
                           + 2 * 4 * (d_p + dc_p)),
    )(x2d, c2d, gx, bx, gc, bc, wx_p, wc_p)

    return out[:, :d_out].reshape(b, s, d_out)


# --------------------------------- modules -----------------------------------

class LinearMix:
    """Example `fn`: x @ Wx + context @ Wc (Pallas matmul kernel)."""

    def __init__(self, wx, wc):
        self.wx = wx
        self.wc = wc

    def __call__(self, x, *, context):
        return linear_mix_pallas(x, self.wx, context, self.wc)


class PreNorm:
    """JAX/Pallas port of the PyTorch PreNorm module."""

    def __init__(self, dim, fn, context_dim=None):
        self.fn = fn
        # torch.nn.LayerNorm default init: weight = 1, bias = 0, eps = 1e-5
        self.norm_gamma = jnp.ones((dim,), jnp.float32)
        self.norm_beta = jnp.zeros((dim,), jnp.float32)
        self.eps = 1e-5
        if context_dim is not None:
            self.ctx_gamma = jnp.ones((context_dim,), jnp.float32)
            self.ctx_beta = jnp.zeros((context_dim,), jnp.float32)
        else:
            self.ctx_gamma = None
            self.ctx_beta = None

    def __call__(self, x, **kwargs):
        has_ctx_norm = self.ctx_gamma is not None and "context" in kwargs

        # Fast path: fully fused LN(x) + LN(context) + linear mix in ONE kernel.
        if has_ctx_norm and isinstance(self.fn, LinearMix):
            return prenorm_linear_mix_fused(
                x, kwargs["context"], self.fn.wx, self.fn.wc,
                self.norm_gamma, self.norm_beta, self.ctx_gamma, self.ctx_beta,
                eps=self.eps)

        # Generic path: one pallas_call normalizes x (and context), then fn.
        if has_ctx_norm:
            xn, cn = dual_layernorm_pallas(
                x, self.norm_gamma, self.norm_beta,
                kwargs["context"], self.ctx_gamma, self.ctx_beta, eps=self.eps)
            kwargs = dict(kwargs, context=cn)
            return self.fn(xn, **kwargs)

        xn = layernorm_pallas(x, self.norm_gamma, self.norm_beta, eps=self.eps)
        return self.fn(xn, **kwargs)


# ----------------------------------- main -------------------------------------

if __name__ == "__main__":
    B, S = 2, 8
    DIM, CTX_DIM, OUT_DIM = 32, 16, 32

    key = jax.random.PRNGKey(0)
    kx, kc, kwx, kwc = jax.random.split(key, 4)
    x = jax.random.normal(kx, (B, S, DIM), jnp.float32)
    context = jax.random.normal(kc, (B, S, CTX_DIM), jnp.float32)
    wx = jax.random.normal(kwx, (DIM, OUT_DIM), jnp.float32) * 0.05
    wc = jax.random.normal(kwc, (CTX_DIM, OUT_DIM), jnp.float32) * 0.05

    # Pure-JAX reference.
    def ln_ref(v, eps=1e-5):
        m = jnp.mean(v, axis=-1, keepdims=True)
        var = jnp.mean((v - m) ** 2, axis=-1, keepdims=True)
        return (v - m) / jnp.sqrt(var + eps)

    ref_mix = (jnp.einsum("bsd,de->bse", ln_ref(x), wx)
               + jnp.einsum("bsc,ce->bse", ln_ref(context), wc))

    # 1) Fused fast path (PreNorm dispatches to the single-kernel version).
    prenorm_fast = PreNorm(DIM, LinearMix(wx, wc), context_dim=CTX_DIM)
    out_fused = jax.block_until_ready(prenorm_fast(x, context=context))

    # 2) Generic path: dual-LayerNorm kernel + Pallas linear-mix fn.
    generic_fn = lambda x_in, context: linear_mix_pallas(x_in, wx, context, wc)
    prenorm_generic = PreNorm(DIM, generic_fn, context_dim=CTX_DIM)
    out_generic = jax.block_until_ready(prenorm_generic(x, context=context))

    # 3) No-context PreNorm (standalone LayerNorm kernel + identity fn).
    prenorm_plain = PreNorm(DIM, lambda v: v)
    out_plain = jax.block_until_ready(prenorm_plain(x))

    assert out_fused.shape == (B, S, OUT_DIM)
    assert out_generic.shape == (B, S, OUT_DIM)
    assert out_plain.shape == (B, S, DIM)
    assert jnp.max(jnp.abs(out_fused - ref_mix)) < 2e-4
    assert jnp.max(jnp.abs(out_generic - ref_mix)) < 2e-4
    assert jnp.max(jnp.abs(out_plain - ln_ref(x))) < 2e-4

    print("KERNEL_OK")
</pallas_src>

<mosaic_0001>
module attributes {stable_mosaic.version = 11 : i64} {
  func.func @_prenorm_mix_kernel(%arg0: i32, %arg1: i32, %arg2: memref<16x128xf32, #tpu.memory_space<vmem>>, %arg3: memref<16x128xf32, #tpu.memory_space<vmem>>, %arg4: memref<1x128xf32, #tpu.memory_space<vmem>>, %arg5: memref<1x128xf32, #tpu.memory_space<vmem>>, %arg6: memref<1x128xf32, #tpu.memory_space<vmem>>, %arg7: memref<1x128xf32, #tpu.memory_space<vmem>>, %arg8: memref<128x128xf32, #tpu.memory_space<vmem>>, %arg9: memref<128x128xf32, #tpu.memory_space<vmem>>, %arg10: memref<16x128xf32, #tpu.memory_space<vmem>>) attributes {dimension_semantics = [#tpu.dimension_semantics<parallel>, #tpu.dimension_semantics<parallel>], iteration_bounds = array<i64: 1, 1>, scalar_prefetch = 0 : i64, scratch_operands = 0 : i64, tpu.core_type = #tpu.core_type<tc>, window_params = [{transform_indices = @transform_0, window_bounds = array<i64: 16, 128>}, {transform_indices = @transform_1, window_bounds = array<i64: 16, 128>}, {pipeline_mode = #tpu.pipeline_mode<synchronous>, transform_indices = @transform_2, window_bounds = array<i64: 1, 128>}, {pipeline_mode = #tpu.pipeline_mode<synchronous>, transform_indices = @transform_3, window_bounds = array<i64: 1, 128>}, {pipeline_mode = #tpu.pipeline_mode<synchronous>, transform_indices = @transform_4, window_bounds = array<i64: 1, 128>}, {pipeline_mode = #tpu.pipeline_mode<synchronous>, transform_indices = @transform_5, window_bounds = array<i64: 1, 128>}, {transform_indices = @transform_6, window_bounds = array<i64: 128, 128>}, {transform_indices = @transform_7, window_bounds = array<i64: 128, 128>}, {transform_indices = @transform_8, window_bounds = array<i64: 16, 128>}]} {
    %c0 = arith.constant 0 : index
    %c0_0 = arith.constant 0 : index
    %0 = vector.load %arg2[%c0, %c0_0] : memref<16x128xf32, #tpu.memory_space<vmem>>, vector<16x128xf32>
    %c0_1 = arith.constant 0 : index
    %c0_2 = arith.constant 0 : index
    %1 = vector.load %arg4[%c0_1, %c0_2] : memref<1x128xf32, #tpu.memory_space<vmem>>, vector<1x128xf32>
    %c0_3 = arith.constant 0 : index
    %c0_4 = arith.constant 0 : index
    %2 = vector.load %arg5[%c0_3, %c0_4] : memref<1x128xf32, #tpu.memory_space<vmem>>, vector<1x128xf32>
    %cst = arith.constant dense<0.000000e+00> : vector<16xf32>
    %3 = vector.multi_reduction <add>, %0, %cst [1] : vector<16x128xf32> to vector<16xf32>
    %4 = vector.shape_cast %3 : vector<16xf32> to vector<16x1xf32>
    %cst_5 = arith.constant 3.125000e-02 : f32
    %5 = vector.broadcast %cst_5 : f32 to vector<16x1xf32>
    %6 = arith.mulf %4, %5 : vector<16x1xf32>
    %7 = vector.broadcast %6 : vector<16x1xf32> to vector<16x128xf32>
    %8 = arith.subf %0, %7 : vector<16x128xf32>
    %9 = tpu.iota {dimensions = array<i32: 1>} : vector<16x128xi32>
    %c32_i32 = arith.constant 32 : i32
    %10 = vector.broadcast %c32_i32 : i32 to vector<16x128xi32>
    %11 = arith.cmpi slt, %9, %10 : vector<16x128xi32>
    %cst_6 = arith.constant 0.000000e+00 : f32
    %12 = vector.broadcast %cst_6 : f32 to vector<16x128xf32>
    %13 = arith.select %11, %8, %12 : vector<16x128xi1>, vector<16x128xf32>
    %14 = arith.mulf %13, %13 : vector<16x128xf32>
    %cst_7 = arith.constant dense<0.000000e+00> : vector<16xf32>
    %15 = vector.multi_reduction <add>, %14, %cst_7 [1] : vector<16x128xf32> to vector<16xf32>
    %16 = vector.shape_cast %15 : vector<16xf32> to vector<16x1xf32>
    %cst_8 = arith.constant 3.125000e-02 : f32
    %17 = vector.broadcast %cst_8 : f32 to vector<16x1xf32>
    %18 = arith.mulf %16, %17 : vector<16x1xf32>
    %cst_9 = arith.constant 9.99999974E-6 : f32
    %19 = vector.broadcast %cst_9 : f32 to vector<16x1xf32>
    %20 = arith.addf %18, %19 : vector<16x1xf32>
    %21 = math.rsqrt %20 : vector<16x1xf32>
    %22 = vector.broadcast %21 : vector<16x1xf32> to vector<16x128xf32>
    %23 = arith.mulf %13, %22 : vector<16x128xf32>
    %24 = vector.broadcast %1 : vector<1x128xf32> to vector<16x128xf32>
    %25 = arith.mulf %23, %24 : vector<16x128xf32>
    %26 = vector.broadcast %2 : vector<1x128xf32> to vector<16x128xf32>
    %27 = arith.addf %25, %26 : vector<16x128xf32>
    %c0_10 = arith.constant 0 : index
    %c0_11 = arith.constant 0 : index
    %28 = vector.load %arg3[%c0_10, %c0_11] : memref<16x128xf32, #tpu.memory_space<vmem>>, vector<16x128xf32>
    %c0_12 = arith.constant 0 : index
    %c0_13 = arith.constant 0 : index
    %29 = vector.load %arg6[%c0_12, %c0_13] : memref<1x128xf32, #tpu.memory_space<vmem>>, vector<1x128xf32>
    %c0_14 = arith.constant 0 : index
    %c0_15 = arith.constant 0 : index
    %30 = vector.load %arg7[%c0_14, %c0_15] : memref<1x128xf32, #tpu.memory_space<vmem>>, vector<1x128xf32>
    %cst_16 = arith.constant dense<0.000000e+00> : vector<16xf32>
    %31 = vector.multi_reduction <add>, %28, %cst_16 [1] : vector<16x128xf32> to vector<16xf32>
    %32 = vector.shape_cast %31 : vector<16xf32> to vector<16x1xf32>
    %cst_17 = arith.constant 6.250000e-02 : f32
    %33 = vector.broadcast %cst_17 : f32 to vector<16x1xf32>
    %34 = arith.mulf %32, %33 : vector<16x1xf32>
    %35 = vector.broadcast %34 : vector<16x1xf32> to vector<16x128xf32>
    %36 = arith.subf %28, %35 : vector<16x128xf32>
    %37 = tpu.iota {dimensions = array<i32: 1>} : vector<16x128xi32>
    %c16_i32 = arith.constant 16 : i32
    %38 = vector.broadcast %c16_i32 : i32 to vector<16x128xi32>
    %39 = arith.cmpi slt, %37, %38 : vector<16x128xi32>
    %cst_18 = arith.constant 0.000000e+00 : f32
    %40 = vector.broadcast %cst_18 : f32 to vector<16x128xf32>
    %41 = arith.select %39, %36, %40 : vector<16x128xi1>, vector<16x128xf32>
    %42 = arith.mulf %41, %41 : vector<16x128xf32>
    %cst_19 = arith.constant dense<0.000000e+00> : vector<16xf32>
    %43 = vector.multi_reduction <add>, %42, %cst_19 [1] : vector<16x128xf32> to vector<16xf32>
    %44 = vector.shape_cast %43 : vector<16xf32> to vector<16x1xf32>
    %cst_20 = arith.constant 6.250000e-02 : f32
    %45 = vector.broadcast %cst_20 : f32 to vector<16x1xf32>
    %46 = arith.mulf %44, %45 : vector<16x1xf32>
    %cst_21 = arith.constant 9.99999974E-6 : f32
    %47 = vector.broadcast %cst_21 : f32 to vector<16x1xf32>
    %48 = arith.addf %46, %47 : vector<16x1xf32>
    %49 = math.rsqrt %48 : vector<16x1xf32>
    %50 = vector.broadcast %49 : vector<16x1xf32> to vector<16x128xf32>
    %51 = arith.mulf %41, %50 : vector<16x128xf32>
    %52 = vector.broadcast %29 : vector<1x128xf32> to vector<16x128xf32>
    %53 = arith.mulf %51, %52 : vector<16x128xf32>
    %54 = vector.broadcast %30 : vector<1x128xf32> to vector<16x128xf32>
    %55 = arith.addf %53, %54 : vector<16x128xf32>
    %c0_22 = arith.constant 0 : index
    %c0_23 = arith.constant 0 : index
    %56 = vector.load %arg8[%c0_22, %c0_23] : memref<128x128xf32, #tpu.memory_space<vmem>>, vector<128x128xf32>
    %cst_24 = arith.constant dense<0.000000e+00> : vector<16x128xf32>
    %57 = tpu.matmul %27, %56, %cst_24 {dimension_numbers = #tpu.dot_dimension_numbers<[1], [0], [0], [1], [0, 0, 1, 1], [], []>} : vector<16x128xf32>, vector<128x128xf32>, vector<16x128xf32> -> vector<16x128xf32>
    %c0_25 = arith.constant 0 : index
    %c0_26 = arith.constant 0 : index
    %58 = vector.load %arg9[%c0_25, %c0_26] : memref<128x128xf32, #tpu.memory_space<vmem>>, vector<128x128xf32>
    %cst_27 = arith.constant dense<0.000000e+00> : vector<16x128xf32>
    %59 = tpu.matmul %55, %58, %cst_27 {dimension_numbers = #tpu.dot_dimension_numbers<[1], [0], [0], [1], [0, 0, 1, 1], [], []>} : vector<16x128xf32>, vector<128x128xf32>, vector<16x128xf32> -> vector<16x128xf32>
    %60 = arith.addf %57, %59 : vector<16x128xf32>
    %c0_28 = arith.constant 0 : index
    %c0_29 = arith.constant 0 : index
    %61 = vector.load %arg10[%c0_28, %c0_29] : memref<16x128xf32, #tpu.memory_space<vmem>>, vector<16x128xf32>
    tpu.vector_store %arg10[%c0_28, %c0_29], %60 {strides = array<i32>} : memref<16x128xf32, #tpu.memory_space<vmem>>, vector<16x128xf32>,
    return
  }
  func.func @transform_0(%arg0: i32, %arg1: i32) -> (i32, i32) {
    %c0_i32 = arith.constant 0 : i32
    %c0_i32_0 = arith.constant 0 : i32
    return %arg0, %c0_i32 : i32, i32
  }
  func.func @transform_1(%arg0: i32, %arg1: i32) -> (i32, i32) {
    %c0_i32 = arith.constant 0 : i32
    %c0_i32_0 = arith.constant 0 : i32
    return %arg0, %c0_i32 : i32, i32
  }
  func.func @transform_2(%arg0: i32, %arg1: i32) -> (i32, i32) {
    %c0_i32 = arith.constant 0 : i32
    %c0_i32_0 = arith.constant 0 : i32
    %c0_i32_1 = arith.constant 0 : i32
    return %c0_i32, %c0_i32_0 : i32, i32
  }
  func.func @transform_3(%arg0: i32, %arg1: i32) -> (i32, i32) {
    %c0_i32 = arith.constant 0 : i32
    %c0_i32_0 = arith.constant 0 : i32
    %c0_i32_1 = arith.constant 0 : i32
    return %c0_i32, %c0_i32_0 : i32, i32
  }
  func.func @transform_4(%arg0: i32, %arg1: i32) -> (i32, i32) {
    %c0_i32 = arith.constant 0 : i32
    %c0_i32_0 = arith.constant 0 : i32
    %c0_i32_1 = arith.constant 0 : i32
    return %c0_i32, %c0_i32_0 : i32, i32
  }
  func.func @transform_5(%arg0: i32, %arg1: i32) -> (i32, i32) {
    %c0_i32 = arith.constant 0 : i32
    %c0_i32_0 = arith.constant 0 : i32
    %c0_i32_1 = arith.constant 0 : i32
    return %c0_i32, %c0_i32_0 : i32, i32
  }
  func.func @transform_6(%arg0: i32, %arg1: i32) -> (i32, i32) {
    %c0_i32 = arith.constant 0 : i32
    %c0_i32_0 = arith.constant 0 : i32
    return %c0_i32, %arg1 : i32, i32
  }
  func.func @transform_7(%arg0: i32, %arg1: i32) -> (i32, i32) {
    %c0_i32 = arith.constant 0 : i32
    %c0_i32_0 = arith.constant 0 : i32
    return %c0_i32, %arg1 : i32, i32
  }
  func.func @transform_8(%arg0: i32, %arg1: i32) -> (i32, i32) {
    %c0_i32 = arith.constant 0 : i32
    return %arg0, %arg1 : i32, i32
  }
}

</mosaic_0001>

<bundles_post_ra>
// kernel: tpu_custom_call.1
= control target key start
LH: loop header
LB: loop body
LE: loop exit
PB: predicated region body
PF: predicated region fallthrough
CT: control target
= control target key end

     0   :  { %13 = vsyncpa [#allocation3], 0  ;;  %s862_s0 = inlined_call_operand.hbm [shape: f32[16,128], index: 0, kind: input, shape index: {}]   ;;  %s863_s1 = inlined_call_operand.hbm [shape: f32[16,128], index: 1, kind: input, shape index: {}]   ;;  %s864_s2 = inlined_call_operand.vmem [shape: f32[1,128], index: 2, kind: input, shape index: {}]   ;;  %s865_s3 = inlined_call_operand.vmem [shape: f32[1,128], index: 3, kind: input, shape index: {}]   ;;  %s866_s4 = inlined_call_operand.vmem [shape: f32[1,128], index: 4, kind: input, shape index: {}]   ;;  %s867_s5 = inlined_call_operand.vmem [shape: f32[1,128], index: 5, kind: input, shape index: {}]   ;;  %s868_s6 = inlined_call_operand.hbm [shape: f32[128,128], index: 6, kind: input, shape index: {}]   ;;  %s869_s7 = inlined_call_operand.hbm [shape: f32[128,128], index: 7, kind: input, shape index: {}]   ;;  %s870_s8 = inlined_call_operand.hbm [shape: f32[16,128], index: 8, kind: output, shape index: {}]  }
   0x1   :  { %14 = vsyncpa [#allocation6], 0 }
   0x2   :  { %15 = vsyncpa [#allocation9], 0 }
   0x3   :  { %16 = vsyncpa [#allocation4], 0  ;;  %s689_s27 = smov [#allocation5]   ;;  %s690_s29 = smov [#allocation2]  }
   0x4   :  { %s34_s28 = sshll.u32 %s689_s27, 4  ;;  %s22_s30 = sshll.u32 %s690_s29, 4  ;;  %s35_s28 = int_to_ptr.vmem [resolvable:$true] %s34_s28  ;;  %s741_s30 = int_to_ptr.vmem [resolvable:$true] %s22_s30 }
   0x5   :  { %s571_s11 = scalar_lea.hbm %s863_s1, 256 }
   0x6   :  { %p572_p0 = scmp.ne.s32.totalorder %s863_s1, %s571_s11  ;;  %p575_p1 = scmp.lt.u32.totalorder %s571_s11, %s863_s1 }
   0x8   :  { %p577_p2 = pnand %p575_p1, %p572_p0 }
   0xa   :  { %580 = shalt.err (!%p577_p2)
}
   0xb   :  { %s581_s16 = scalar_lea.vmem %s35_s28, 256  ;;  %p586_p4 = scmp.lt.s32.totalorder %s35_s28, %s35_s28 }
   0xc   :  { %p582_p3 = scmp.ne.s32.totalorder %s35_s28, %s581_s16  ;;  %p587_p5 = scmp.lt.s32.totalorder %s581_s16, %s581_s16 }
   0xe   :  { %p588_p6 = por %p587_p5, %p586_p4 }
  0x10   :  { %p589_p7 = pnand %p588_p6, %p582_p3 }
  0x12   :  { %592 = shalt.err (!%p589_p7)
}
  0x13   :  { %s691_s17 = smov 128   ;;  %s692_s18 = smov 8  }
  0x14   :  { %40 = dma.hbm_to_vmem [thread:$0]  %s863_s1, 256, %s35_s28, [#allocation6], %s691_s17, %s691_s17, %s692_s18  }
  0x15   :  { %s593_s23 = scalar_lea.hbm %s862_s0, 256 }
  0x16   :  { %p594_p8 = scmp.ne.s32.totalorder %s862_s0, %s593_s23  ;;  %p597_p9 = scmp.lt.u32.totalorder %s593_s23, %s862_s0 }
  0x18   :  { %p599_p10 = pnand %p597_p9, %p594_p8 }
  0x1a   :  { %602 = shalt.err (!%p599_p10)
}
  0x1b   :  { %s603_s29 = scalar_lea.vmem %s741_s30, 256  ;;  %p608_p12 = scmp.lt.s32.totalorder %s741_s30, %s741_s30 }
  0x1c   :  { %p604_p11 = scmp.ne.s32.totalorder %s741_s30, %s603_s29  ;;  %p609_p13 = scmp.lt.s32.totalorder %s603_s29, %s603_s29 }
  0x1e   :  { %p610_p0 = por %p609_p13, %p608_p12 }
  0x20   :  { %p611_p1 = pnand %p610_p0, %p604_p11 }
  0x22   :  { %614 = shalt.err (!%p611_p1)
}
  0x23   :  { %28 = dma.hbm_to_vmem [thread:$0]  %s862_s0, 256, %s741_s30, [#allocation3], %s691_s17, %s691_s17, %s692_s18  }
  0x24   :  { %s693_s9 = smov [#allocation7]   ;;  %s694_s11 = smov [#allocation8]  }
  0x25   :  { %s54_s10 = sshll.u32 %s693_s9, 4  ;;  %s66_s12 = sshll.u32 %s694_s11, 4  ;;  %s55_s10 = int_to_ptr.vmem [resolvable:$true] %s54_s10  ;;  %s778_s12 = int_to_ptr.vmem [resolvable:$true] %s66_s12 }
  0x26   :  { %s615_s15 = scalar_lea.hbm %s868_s6, 2048 }
  0x27   :  { %p616_p2 = scmp.ne.s32.totalorder %s868_s6, %s615_s15  ;;  %p619_p3 = scmp.lt.u32.totalorder %s615_s15, %s868_s6 }
  0x29   :  { %p621_p4 = pnand %p619_p3, %p616_p2 }
  0x2b   :  { %624 = shalt.err (!%p621_p4)
}
  0x2c   :  { %s625_s0 = scalar_lea.vmem %s55_s10, 2048  ;;  %p630_p6 = scmp.lt.s32.totalorder %s55_s10, %s55_s10 }
  0x2d   :  { %p626_p5 = scmp.ne.s32.totalorder %s55_s10, %s625_s0  ;;  %p631_p7 = scmp.lt.s32.totalorder %s625_s0, %s625_s0 }
  0x2f   :  { %p632_p8 = por %p631_p7, %p630_p6 }
  0x31   :  { %p633_p9 = pnand %p632_p8, %p626_p5 }
  0x33   :  { %636 = shalt.err (!%p633_p9)
}
  0x34   :  { %60 = dma.hbm_to_vmem [thread:$0]  %s868_s6, 2048, %s55_s10, [#allocation6], %s691_s17, %s691_s17, %s692_s18  }
  0x35   :  { %s637_s25 = scalar_lea.hbm %s869_s7, 2048 }
  0x36   :  { %p638_p10 = scmp.ne.s32.totalorder %s869_s7, %s637_s25  ;;  %p641_p11 = scmp.lt.u32.totalorder %s637_s25, %s869_s7 }
  0x38   :  { %p643_p12 = pnand %p641_p11, %p638_p10 }
  0x3a   :  { %646 = shalt.err (!%p643_p12)
}
  0x3b   :  { %s647_s28 = scalar_lea.vmem %s778_s12, 2048  ;;  %p652_p0 = scmp.lt.s32.totalorder %s778_s12, %s778_s12 }
  0x3c   :  { %p648_p13 = scmp.ne.s32.totalorder %s778_s12, %s647_s28  ;;  %p653_p1 = scmp.lt.s32.totalorder %s647_s28, %s647_s28 }
  0x3e   :  { %p654_p2 = por %p653_p1, %p652_p0 }
  0x40   :  { %p655_p3 = pnand %p654_p2, %p648_p13 }
  0x42   :  { %658 = shalt.err (!%p655_p3)
}
  0x43   :  { %72 = dma.hbm_to_vmem [thread:$0]  %s869_s7, 2048, %s778_s12, [#allocation9], %s691_s17, %s691_s17, %s692_s18  }
  0x44   :  { %681 = dma.done.wait [#allocation3], 256  }
  0x45   :  { %682 = vsyncadd [#allocation3], 4294967040 }
  0x46   :  { %683 = dma.done.wait [#allocation6], 2304  }
  0x47   :  { %684 = vsyncadd [#allocation6], 4294964992 }
  0x48   :  { %685 = dma.done.wait [#allocation9], 2048  }
  0x49   :  { %686 = vsyncadd [#allocation9], 4294965248  ;;  %v85_v0 = vld [vmem:[#allocation2] sm:$0xff]  ;;  %v86_v1 = vld [vmem:[#allocation2 + $0x8] sm:$0xff]  ;;  %v97_v13 = vlaneseq }
  0x4a   :  { %89 = vadd.xlane.f32.xlu0 %v85_v0  ;;  %91 = vadd.xlane.f32.xlu1 %v86_v1  ;;  %v132_v2 = vld [vmem:[#allocation5] sm:$0xff]  ;;  %v133_v3 = vld [vmem:[#allocation5 + $0x8] sm:$0xff]  ;;  %v177_v4 = vld [vmem:[#allocation7] sm:$0xff] }
  0x4b   :  { %v178_v5 = vld [vmem:[#allocation7 + $0x8] sm:$0xff]  ;;  %v193_v6 = vld [vmem:[#allocation8] sm:$0xff]  ;;  %v179_v9 = vld [vmem:[#allocation7 + $0x10] sm:$0xff]  ;;  %v98_v14 = vand.u32 127, %v97_v13 }
  0x4c   :  { %v522_v7 = vpack.c.bf16 %v178_v5, %v177_v4  ;;  %v194_v8 = vld [vmem:[#allocation8 + $0x8] sm:$0xff]  ;;  %v180_v10 = vld [vmem:[#allocation7 + $0x18] sm:$0xff]  ;;  %v195_v35 = vld [vmem:[#allocation8 + $0x10] sm:$0xff] }
  0x4d   :  { %v490_v11 = vpack.c.bf16 %v194_v8, %v193_v6  ;;  %v526_v12 = vpack.c.bf16 %v180_v10, %v179_v9  ;;  %vm99_vm0 = vcmp.lt.s32.totalorder %v98_v14, 32  ;;  %vm144_vm1 = vcmp.lt.s32.totalorder %v98_v14, 16  ;;  %v196_v36 = vld [vmem:[#allocation8 + $0x18] sm:$0xff]  ;;  %v181_v37 = vld [vmem:[#allocation7 + $0x20] sm:$0xff]  ;;  %v182_v39 = vld [vmem:[#allocation7 + $0x28] sm:$0xff] }
  0x4e   :  { %136 = vadd.xlane.f32.xlu0 %v132_v2  ;;  %138 = vadd.xlane.f32.xlu1 %v133_v3  ;;  %v494_v38 = vpack.c.bf16 %v196_v36, %v195_v35  ;;  %v530_v40 = vpack.c.bf16 %v182_v39, %v181_v37  ;;  %v197_v41 = vld [vmem:[#allocation8 + $0x20] sm:$0xff]  ;;  %v198_v42 = vld [vmem:[#allocation8 + $0x28] sm:$0xff]  ;;  %v183_v43 = vld [vmem:[#allocation7 + $0x30] sm:$0xff] }
  0x4f   :  { %523 = vmatprep.subr.bf16.mxu0 %v522_v7  ;;  %491 = vmatprep.subr.bf16.mxu1 %v490_v11  ;;  %v498_v44 = vpack.c.bf16 %v198_v42, %v197_v41  ;;  %v184_v45 = vld [vmem:[#allocation7 + $0x38] sm:$0xff]  ;;  %v199_v47 = vld [vmem:[#allocation8 + $0x30] sm:$0xff]  ;;  %v185_v49 = vld [vmem:[#allocation7 + $0x40] sm:$0xff] }
  0x50   :  { %525 = vmatpush3.bf16.msra.mxu0 %v522_v7  ;;  %493 = vmatpush3.bf16.msra.mxu1 %v490_v11  ;;  %v534_v46 = vpack.c.bf16 %v184_v45, %v183_v43  ;;  %v200_v48 = vld [vmem:[#allocation8 + $0x38] sm:$0xff]  ;;  %v186_v51 = vld [vmem:[#allocation7 + $0x48] sm:$0xff]  ;;  %v201_v53 = vld [vmem:[#allocation8 + $0x40] sm:$0xff] }
  0x51   :  { %527 = vmatprep.subr.bf16.mxu0 %v526_v12  ;;  %495 = vmatprep.subr.bf16.mxu1 %v494_v38  ;;  %v502_v50 = vpack.c.bf16 %v200_v48, %v199_v47  ;;  %v538_v52 = vpack.c.bf16 %v186_v51, %v185_v49  ;;  %v202_v54 = vld [vmem:[#allocation8 + $0x48] sm:$0xff]  ;;  %v187_v55 = vld [vmem:[#allocation7 + $0x50] sm:$0xff]  ;;  %v188_v57 = vld [vmem:[#allocation7 + $0x58] sm:$0xff] }
  0x52   :  { %v506_v56 = vpack.c.bf16 %v202_v54, %v201_v53  ;;  %v203_v58 = vld [vmem:[#allocation8 + $0x50] sm:$0xff]  ;;  %v204_v59 = vld [vmem:[#allocation8 + $0x58] sm:$0xff]  ;;  %v542_v60 = vpack.c.bf16 %v188_v57, %v187_v55  ;;  %v189_v62 = vld [vmem:[#allocation7 + $0x60] sm:$0xff] }
  0x53   :  { %v510_v61 = vpack.c.bf16 %v204_v59, %v203_v58  ;;  %v190_v63 = vld [vmem:[#allocation7 + $0x68] sm:$0xff]  ;;  %v192_v4 = vld [vmem:[#allocation7 + $0x78] sm:$0xff]  ;;  %v207_v7 = vld [vmem:[#allocation8 + $0x70] sm:$0xff] }
  0x54   :  { %529 = vmatpush3.bf16.msra.mxu0 %v526_v12  ;;  %497 = vmatpush3.bf16.msra.mxu1 %v494_v38  ;;  %v208_v8 = vld [vmem:[#allocation8 + $0x78] sm:$0xff] }
  0x55   :  { %531 = vmatprep.subr.bf16.mxu0 %v530_v40  ;;  %499 = vmatprep.subr.bf16.mxu1 %v498_v44  ;;  %v518_v9 = vpack.c.bf16 %v208_v8, %v207_v7 }
  0x58   :  { %533 = vmatpush3.bf16.msra.mxu0 %v530_v40  ;;  %501 = vmatpush3.bf16.msra.mxu1 %v498_v44 }
  0x59   :  { %535 = vmatprep.subr.bf16.mxu0 %v534_v46  ;;  %503 = vmatprep.subr.bf16.mxu1 %v502_v50 }
  0x5c   :  { %537 = vmatpush3.bf16.msra.mxu0 %v534_v46  ;;  %505 = vmatpush3.bf16.msra.mxu1 %v502_v50 }
  0x5d   :  { %539 = vmatprep.subr.bf16.mxu0 %v538_v52  ;;  %507 = vmatprep.subr.bf16.mxu1 %v506_v56 }
  0x60   :  { %541 = vmatpush3.bf16.msra.mxu0 %v538_v52  ;;  %509 = vmatpush3.bf16.msra.mxu1 %v506_v56 }
  0x61   :  { %543 = vmatprep.subr.bf16.mxu0 %v542_v60  ;;  %511 = vmatprep.subr.bf16.mxu1 %v510_v61 }
  0x64   :  { %545 = vmatpush3.bf16.msra.mxu0 %v542_v60  ;;  %513 = vmatpush3.bf16.msra.mxu1 %v510_v61 }
  0xd7   :  { %v90_v15 = vpop.xlane.xlu0 %89  ;;  %v92_v16 = vpop.xlane.xlu1 %91 }
  0xd8   :  { %v93_v17 = vmul.f32 0.03125, %v90_v15  ;;  %v94_v18 = vmul.f32 0.03125, %v92_v16 }
  0xda   :  { %v95_v19 = vsub.f32 %v85_v0, %v93_v17  ;;  %v96_v20 = vsub.f32 %v86_v1, %v94_v18  ;;  %v205_v0 = vld [vmem:[#allocation8 + $0x60] sm:$0xff]  ;;  %v546_v1 = vpack.c.bf16 %v190_v63, %v189_v62 }
  0xdb   :  { %v137_v21 = vpop.xlane.xlu0 %136  ;;  %v139_v22 = vpop.xlane.xlu1 %138 }
  0xdc   :  { %v140_v23 = vmul.f32 0.0625, %v137_v21  ;;  %v141_v24 = vmul.f32 0.0625, %v139_v22  ;;  %v815_v25 = vsel %vm99_vm0, %v95_v19, 0.0  ;;  %v817_v26 = vsel %vm99_vm0, %v96_v20, 0.0  ;;  %547 = vmatprep.subr.bf16.mxu0 %v546_v1 }
  0xdd   :  { %v102_v27 = vmul.f32 %v815_v25, %v815_v25  ;;  %v103_v30 = vmul.f32 %v817_v26, %v817_v26  ;;  %549 = vmatpush3.bf16.msra.mxu0 %v546_v1 }
  0xde   :  { %v142_v28 = vsub.f32 %v132_v2, %v140_v23  ;;  %v143_v29 = vsub.f32 %v133_v3, %v141_v24  ;;  %v206_v2 = vld [vmem:[#allocation8 + $0x68] sm:$0xff]  ;;  %v191_v3 = vld [vmem:[#allocation7 + $0x70] sm:$0xff]  ;;  %v380_v23 = vld [vmem:[%s864_s2] ss:$0 sm:$0xff] }
  0xdf   :  { %104 = vadd.xlane.f32.xlu0 %v102_v27  ;;  %v514_v5 = vpack.c.bf16 %v206_v2, %v205_v0  ;;  %v550_v6 = vpack.c.bf16 %v192_v4, %v191_v3  ;;  %v381_v27 = vld [vmem:[%s865_s3] ss:$0 sm:$0xff]  ;;  %s695_s3 = smov [#allocation10]  }
  0xe0   :  { %v823_v31 = vsel %vm144_vm1, %v142_v28, 0.0  ;;  %v825_v32 = vsel %vm144_vm1, %v143_v29, 0.0 }
  0xe1   :  { %v147_v33 = vmul.f32 %v823_v31, %v823_v31  ;;  %v148_v34 = vmul.f32 %v825_v32, %v825_v32  ;;  %515 = vmatprep.subr.bf16.mxu1 %v514_v5  ;;  %551 = vmatprep.subr.bf16.mxu0 %v550_v6 }
  0xe2   :  { %517 = vmatpush3.bf16.msra.mxu1 %v514_v5  ;;  %553 = vmatpush3.bf16.msra.mxu0 %v550_v6 }
  0xe3   :  { %106 = vadd.xlane.f32.xlu0 %v103_v30  ;;  %149 = vadd.xlane.f32.xlu1 %v147_v33  ;;  %v382_v30 = vld [vmem:[%s866_s4] ss:$0 sm:$0xff]  ;;  %s366_s4 = sshll.u32 %s695_s3, 4  ;;  %s367_s4 = int_to_ptr.vmem [resolvable:$true] %s366_s4 }
  0xe4   :  { %519 = vmatprep.subr.bf16.mxu1 %v518_v9  ;;  %p664_p5 = scmp.lt.s32.totalorder %s367_s4, %s367_s4 }
  0xe6   :  { %521 = vmatpush3.bf16.msra.mxu1 %v518_v9 }
  0xe7   :  { %151 = vadd.xlane.f32.xlu1 %v148_v34 }
 0x16c   :  { %v105_v10 = vpop.xlane.xlu0 %104 }
 0x16d   :  { %v108_v11 = vmul.f32 0.03125, %v105_v10 }
 0x16f   :  { %v110_v12 = vadd.f32 1e-05, %v108_v11 }
 0x170   :  { %v150_v13 = vpop.xlane.xlu1 %149  ;;  %v107_v14 = vpop.xlane.xlu0 %106 }
 0x171   :  { %563 = vrsqrt.f32 %v110_v12  ;;  %v153_v15 = vmul.f32 0.0625, %v150_v13  ;;  %v109_v16 = vmul.f32 0.03125, %v107_v14 }
 0x173   :  { %v155_v17 = vadd.f32 1e-05, %v153_v15  ;;  %v111_v18 = vadd.f32 1e-05, %v109_v16 }
 0x174   :  { %v152_v19 = vpop.xlane.xlu1 %151 }
 0x175   :  { %565 = vrsqrt.f32 %v155_v17  ;;  %v154_v20 = vmul.f32 0.0625, %v152_v19 }
 0x176   :  { %567 = vrsqrt.f32 %v111_v18 }
 0x177   :  { %v156_v21 = vadd.f32 1e-05, %v154_v20 }
 0x179   :  { %569 = vrsqrt.f32 %v156_v21 }
 0x17b   :  { %v564_v22 = vpop.eup %563 }
 0x17c   :  { %v114_v24 = vmul.f32 %v564_v22, %v815_v25  ;;  %v383_v25 = vld [vmem:[%s867_s5] ss:$0 sm:$0xff]  ;;  %s659_s5 = scalar_lea.vmem %s367_s4, 256 }
 0x17d   :  { %p660_p4 = scmp.ne.s32.totalorder %s367_s4, %s659_s5  ;;  %p665_p6 = scmp.lt.s32.totalorder %s659_s5, %s659_s5 }
 0x17e   :  { %v122_v28 = vmul.f32 %v380_v23, %v114_v24 }
 0x17f   :  { %v566_v29 = vpop.eup %565  ;;  %p666_p7 = por %p665_p6, %p664_p5 }
 0x180   :  { %v568_v33 = vpop.eup %567  ;;  %v130_v34 = vadd.f32 %v381_v27, %v122_v28  ;;  %v159_v35 = vmul.f32 %v566_v29, %v823_v31 }
 0x181   :  { %v115_v36 = vmul.f32 %v568_v33, %v817_v26  ;;  %p667_p8 = pnand %p666_p7, %p660_p4 }
 0x182   :  { %487 = vmatprep.mubr.f32.mxu0 %v130_v34  ;;  %v167_v37 = vmul.f32 %v382_v30, %v159_v35 }
 0x183   :  { %v570_v38 = vpop.eup %569  ;;  %v123_v39 = vmul.f32 %v380_v23, %v115_v36 }
 0x184   :  { %v160_v40 = vmul.f32 %v570_v38, %v825_v32  ;;  %v175_v41 = vadd.f32 %v383_v25, %v167_v37 }
 0x185   :  { %v131_v42 = vadd.f32 %v381_v27, %v123_v39 }
 0x186   :  { %v168_v43 = vmul.f32 %v382_v30, %v160_v40  ;;  %452 = vmatprep.mubr.f32.mxu1 %v175_v41 }
 0x187   :  { %488 = vmatmul.mubr.f32.vlgmr.msra.gmra.mrb[0].mxu0 %v131_v42 }
 0x188   :  { %v176_v44 = vadd.f32 %v383_v25, %v168_v43 }
 0x18a   :  { %453 = vmatmul.mubr.f32.vlgmr.msra.gmra.mrb[0].mxu1 %v176_v44 }
 0x25a   :  { %v489_v31 = vpop.f32.mrb[0].mxu0 }
 0x25b   :  { %v350_v45 = vpop.f32.mrb[1].mxu0 }
 0x25d   :  { %v454_v26 = vpop.f32.mrb[0].mxu1 }
 0x25e   :  { %v356_v46 = vadd.f32 %v489_v31, %v454_v26  ;;  %v275_v47 = vpop.f32.mrb[1].mxu1 }
 0x25f   :  { %v351_v48 = vadd.f32 %v350_v45, %v275_v47 }
 0x260   :  { %360 = vst [vmem:[#allocation10 + $0x8] sm:$0xff] %v356_v46 }
 0x261   :  { %359 = vst [vmem:[#allocation10] sm:$0xff] %v351_v48 }
 0x262   :  { %670 = shalt.err (!%p667_p8)
}
 0x263   :  { %s671_s20 = scalar_lea.hbm %s870_s8, 256 }
 0x264   :  { %p672_p9 = scmp.ne.s32.totalorder %s870_s8, %s671_s20  ;;  %p675_p10 = scmp.lt.u32.totalorder %s671_s20, %s870_s8 }
 0x266   :  { %p677_p11 = pnand %p675_p10, %p672_p9 }
 0x268   :  { %680 = shalt.err (!%p677_p11)
}
 0x269   :  { %372 = dma.vmem_to_hbm [thread:$0]  %s367_s4, 256, %s870_s8, [#allocation4], %s691_s17, %s691_s17, %s692_s18  }
 0x26a   :  { %687 = dma.done.wait [#allocation4], 256  }
 0x26b   :  { %688 = vsyncadd [#allocation4], 4294967040 }
 0x26c   :  { %376 = vsyncpa [#allocation3], 1 }
 0x26d   :  { %377 = vsyncpa [#allocation6], 1 }
 0x26e   :  { %378 = vsyncpa [#allocation9], 1 }
 0x26f   :  { %379 = vsyncpa [#allocation4], 1 }

</bundles_post_ra>
